<compile_context>
chip_gen: v5e
topology: v5e:2x2
jax: 0.10.0
libtpu: 0.0.40
codegen_flags: <defaults>
</compile_context>

<pallas_src>
import jax
import jax.numpy as jnp
from jax.experimental import pallas as pl
from jax.experimental.pallas import tpu as pltpu

_LANE = 128                     # vreg lane width: lane-dense, unmasked stores
_TARGET_TILE_BYTES = 4 << 20    # ~4 MiB per tile (per array, per buffer)
_MIN_TILE_ROWS = 1024           # never shrink tiles below this just to add steps


def _round_up(x, m):
    return ((x + m - 1) // m) * m


def _h_sigmoid_kernel(x_ref, o_ref):
    x = x_ref[...]
    # relu6(x + 3) * (1/6) -- pure VPU clip-and-scale in the input dtype.
    o_ref[...] = (jnp.clip(x + 3.0, 0.0, 6.0) * (1.0 / 6.0)).astype(o_ref.dtype)


def h_sigmoid(x):
    """Elementwise hard-sigmoid over an arbitrarily shaped floating array."""
    dtype = x.dtype
    if not jnp.issubdtype(dtype, jnp.floating):
        raise TypeError(f"h_sigmoid expects a floating dtype, got {dtype}")

    orig_shape = x.shape
    total = x.size
    itemsize = jnp.dtype(dtype).itemsize
    # Sublane packing: 8 for 4-byte, 16 for 2-byte, 32 for 1-byte dtypes.
    sublane = 8 * max(1, 4 // itemsize)

    rows = pl.cdiv(total, _LANE)
    flat = x.reshape(-1)
    needs_pad = (total % _LANE) != 0
    if needs_pad:
        # Rare ragged path: pad the tail to a full, sublane-aligned [rows, 128]
        # slab. Padded elements are computed (h_sigmoid(0)=0.5) and discarded.
        rows = _round_up(rows, sublane)
        flat = jnp.pad(flat, (0, rows * _LANE - total))
    x2 = flat.reshape(rows, _LANE)   # fast path: free reshape, no copies

    # --- tile-row selection -------------------------------------------------
    max_tile_rows = max(sublane, _TARGET_TILE_BYTES // (_LANE * itemsize))
    n_steps = pl.cdiv(rows, max_tile_rows)
    if rows >= 4 * _MIN_TILE_ROWS:
        n_steps = max(n_steps, 4)        # enough steps to fill the pipeline
    if n_steps > 1 and (n_steps % 2):
        n_steps += 1                     # even split across v7x's two TensorCores
    tm = _round_up(pl.cdiv(rows, n_steps), sublane)
    tm = min(max(tm, sublane), _round_up(rows, sublane))

    grid = (pl.cdiv(rows, tm),)          # boundary block (if any) is masked by Pallas

    cost = pl.CostEstimate(
        flops=2 * total,                               # add + mul (clip is select)
        transcendentals=0,
        bytes_accessed=2 * rows * _LANE * itemsize,    # actual read + write traffic
    )

    out2 = pl.pallas_call(
        _h_sigmoid_kernel,
        out_shape=jax.ShapeDtypeStruct((rows, _LANE), dtype),
        grid=grid,
        in_specs=[pl.BlockSpec((tm, _LANE), lambda i: (i, 0))],
        out_specs=pl.BlockSpec((tm, _LANE), lambda i: (i, 0)),
        compiler_params=pltpu.CompilerParams(
            dimension_semantics=("parallel",),   # shard rows across TCs (v7x megacore)
            vmem_limit_bytes=32 << 20,           # 4 x ~4 MiB double-buffered tiles + slack
        ),
        cost_estimate=cost,
    )(x2)

    out = out2.reshape(-1)
    if needs_pad:
        out = out[:total]
    return out.reshape(orig_shape)


if __name__ == "__main__":
    key = jax.random.PRNGKey(0)
    # NCHW activation, typical input to h_sigmoid inside an attention/SE block.
    x = jax.random.normal(key, (2, 4, 16, 16), dtype=jnp.float32) * 4.0

    out = h_sigmoid(x)
    jax.block_until_ready(out)

    # reference: relu6(x + 3) / 6 in plain JAX
    ref = jnp.clip(x + 3.0, 0.0, 6.0) / 6.0
    assert out.shape == x.shape
    assert jnp.allclose(out, ref, atol=1e-6, rtol=1e-6), "mismatch vs reference"

    print("KERNEL_OK")
</pallas_src>

<mosaic_0001>
module attributes {stable_mosaic.version = 11 : i64} {
  func.func @_h_sigmoid_kernel(%arg0: i32, %arg1: memref<16x128xf32, #tpu.memory_space<vmem>>, %arg2: memref<16x128xf32, #tpu.memory_space<vmem>>) attributes {dimension_semantics = [#tpu.dimension_semantics<parallel>], iteration_bounds = array<i64: 1>, scalar_prefetch = 0 : i64, scratch_operands = 0 : i64, tpu.core_type = #tpu.core_type<tc>, window_params = [{transform_indices = @transform_0, window_bounds = array<i64: 16, 128>}, {transform_indices = @transform_1, window_bounds = array<i64: 16, 128>}]} {
    %c0 = arith.constant 0 : index
    %c0_0 = arith.constant 0 : index
    %0 = vector.load %arg1[%c0, %c0_0] : memref<16x128xf32, #tpu.memory_space<vmem>>, vector<16x128xf32>
    %cst = arith.constant 3.000000e+00 : f32
    %1 = vector.broadcast %cst : f32 to vector<16x128xf32>
    %2 = arith.addf %0, %1 : vector<16x128xf32>
    %cst_1 = arith.constant 0.000000e+00 : f32
    %cst_2 = arith.constant 6.000000e+00 : f32
    %3 = vector.broadcast %cst_1 : f32 to vector<16x128xf32>
    %4 = arith.maximumf %3, %2 : vector<16x128xf32>
    %5 = vector.broadcast %cst_2 : f32 to vector<16x128xf32>
    %6 = arith.minimumf %5, %4 : vector<16x128xf32>
    %cst_3 = arith.constant 0.166666672 : f32
    %7 = vector.broadcast %cst_3 : f32 to vector<16x128xf32>
    %8 = arith.mulf %6, %7 : vector<16x128xf32>
    %c0_4 = arith.constant 0 : index
    %c0_5 = arith.constant 0 : index
    %9 = vector.load %arg2[%c0_4, %c0_5] : memref<16x128xf32, #tpu.memory_space<vmem>>, vector<16x128xf32>
    tpu.vector_store %arg2[%c0_4, %c0_5], %8 {strides = array<i32>} : memref<16x128xf32, #tpu.memory_space<vmem>>, vector<16x128xf32>,
    return
  }
  func.func @transform_0(%arg0: i32) -> (i32, i32) {
    %c0_i32 = arith.constant 0 : i32
    %c0_i32_0 = arith.constant 0 : i32
    return %arg0, %c0_i32 : i32, i32
  }
  func.func @transform_1(%arg0: i32) -> (i32, i32) {
    %c0_i32 = arith.constant 0 : i32
    %c0_i32_0 = arith.constant 0 : i32
    return %arg0, %c0_i32 : i32, i32
  }
}

</mosaic_0001>

<bundles_post_ra>
// kernel: tpu_custom_call.1
= control target key start
LH: loop header
LB: loop body
LE: loop exit
PB: predicated region body
PF: predicated region fallthrough
CT: control target
= control target key end

     0   :  { %6 = vsyncpa [#allocation3], 0  ;;  %s132_s0 = inlined_call_operand.hbm [shape: f32[16,128], index: 0, kind: input, shape index: {}]   ;;  %s133_s1 = inlined_call_operand.hbm [shape: f32[16,128], index: 1, kind: output, shape index: {}]  }
   0x1   :  { %7 = vsyncpa [#allocation4], 0  ;;  %s12_s8 = sshll.u32 %s132_s0, 4  ;;  %s112_s9 = smov [#allocation2]   ;;  %s13_s8 = int_to_ptr.hbm [resolvable:$true] %s12_s8 }
   0x2   :  { %s14_s10 = sshll.u32 %s112_s9, 4  ;;  %s113_s11 = smov 128   ;;  %s15_s10 = int_to_ptr.vmem [resolvable:$true] %s14_s10 }
   0x3   :  { %s114_s12 = smov 8  }
   0x4   :  { %20 = dma.hbm_to_vmem [thread:$0]  %s13_s8, 256, %s15_s10, [#allocation3], %s113_s11, %s113_s11, %s114_s12  }
   0x5   :  { %108 = dma.done.wait [#allocation3], 256  }
   0x6   :  { %109 = vsyncadd [#allocation3], 4294967040  ;;  %v25_v0 = vld [vmem:[#allocation2] sm:$0xff]  ;;  %v26_v1 = vld [vmem:[#allocation2 + $0x8] sm:$0xff]  ;;  %s115_s13 = smov [#allocation5]   ;;  %s43_s16 = sshll.u32 %s133_s1, 4  ;;  %s44_s16 = int_to_ptr.hbm [resolvable:$true] %s43_s16 }
   0x7   :  { %v27_v2 = vadd.f32 3.0, %v25_v0  ;;  %v28_v3 = vadd.f32 3.0, %v26_v1  ;;  %s41_s14 = sshll.u32 %s115_s13, 4  ;;  %s42_s14 = int_to_ptr.vmem [resolvable:$true] %s41_s14 }
   0x9   :  { %v29_v4 = vmax.f32 %v27_v2, 0.0  ;;  %v30_v5 = vmax.f32 %v28_v3, 0.0 }
   0xb   :  { %v31_v6 = vmin.f32 %v29_v4, 6.0  ;;  %v32_v7 = vmin.f32 %v30_v5, 6.0 }
   0xd   :  { %v33_v8 = vmul.f32 0.16666667, %v31_v6  ;;  %v34_v9 = vmul.f32 0.16666667, %v32_v7 }
   0xf   :  { %35 = vst [vmem:[#allocation5] sm:$0xff] %v33_v8 }
  0x10   :  { %36 = vst [vmem:[#allocation5 + $0x8] sm:$0xff] %v34_v9 }
  0x11   :  { %49 = dma.vmem_to_hbm [thread:$0]  %s42_s14, 256, %s44_s16, [#allocation4], %s113_s11, %s113_s11, %s114_s12  }
  0x12   :  { %110 = dma.done.wait [#allocation4], 256  }
  0x13   :  { %111 = vsyncadd [#allocation4], 4294967040 }
  0x14   :  { %54 = vsyncpa [#allocation3], 1 }
  0x15   :  { %55 = vsyncpa [#allocation4], 1 }

</bundles_post_ra>
